<compile_context>
chip_gen: v5e
topology: v5e:2x2
jax: 0.10.0
libtpu: 0.0.40
codegen_flags: <defaults>
</compile_context>

<pallas_src>
import functools

import jax
import jax.numpy as jnp
from jax.experimental import pallas as pl
from jax.experimental.pallas import tpu as pltpu

SIZE_DIVISIBLE = 32
_MIB = 1024 * 1024


def _round_up(v: int, d: int) -> int:
    return ((v + d - 1) // d) * d


def _cdiv(a: int, b: int) -> int:
    return (a + b - 1) // b


def _default_block_budget() -> int:
    """Per-step (input block + output block) byte budget, generation-aware."""
    vmem_bytes = 0
    try:
        info = pltpu.get_tpu_info()
        vmem_bytes = (getattr(info, "vmem_capacity_bytes", None)
                      or getattr(info, "vmem_bytes", 0) or 0)
    except Exception:
        vmem_bytes = 0
    if vmem_bytes >= 100 * _MIB:
        return 16 * _MIB   # v5e / v6e: 128 MiB physical VMEM
    return 8 * _MIB        # v7x (64 MiB physical) or unknown: conservative


def _pad_plane_kernel(x_ref, o_ref, *, h, w, h_pad, w_pad):
    """Whole-plane path: x_ref (b, h, w) -> o_ref (b, h_pad, w_pad).

    Writes three disjoint regions directly (no concat temp), each output
    element exactly once:
      [:, :h, :w]  copy of the input
      [:, :h, w:]  right zero strip   (only emitted when w_pad > w)
      [:, h:, :]   bottom zero strip  (only emitted when h_pad > h)
    """
    b = o_ref.shape[0]
    o_ref[:, :h, :w] = x_ref[...]
    if w_pad > w:
        o_ref[:, :h, w:] = jnp.zeros((b, h, w_pad - w), o_ref.dtype)
    if h_pad > h:
        o_ref[:, h:, :] = jnp.zeros((b, h_pad - h, w_pad), o_ref.dtype)


def _pad_rows_kernel(x_ref, o_ref, *, h, w, w_pad, tile_h):
    """Row-tiled path for large planes.

    x_ref: (1, tile_h, w)   rows of the input; the row-block index is clamped
                            in the index_map, so tiles whose output rows lie
                            (partially or fully) past H may contain stale rows.
    o_ref: (1, tile_h, w_pad)

    The zero-mask is driven by the OUTPUT row position (program_id), so those
    stale rows are always overwritten with zeros regardless of what was read.
    Interior tiles (the vast majority) skip the mask and do a straight copy.
    """
    row0 = pl.program_id(1) * tile_h

    @pl.when(row0 + tile_h <= h)
    def _():
        o_ref[:, :, :w] = x_ref[...]          # interior tile: straight copy

    @pl.when(row0 + tile_h > h)
    def _():
        rows = row0 + jax.lax.broadcasted_iota(jnp.int32, (1, tile_h, 1), 1)
        x = x_ref[...]
        o_ref[:, :, :w] = jnp.where(rows < h, x, jnp.zeros_like(x))

    if w_pad > w:                              # right zero strip (static)
        o_ref[:, :, w:] = jnp.zeros((1, tile_h, w_pad - w), o_ref.dtype)


def batch_images_pallas(x: jax.Array, block_bytes_budget: int | None = None) -> jax.Array:
    """Pallas equivalent of GeneralizedRCNNTransform.batch_images for a stacked
    batch of same-sized images.

    x: (N, C, H, W) -> (N, C, H_pad, W_pad), zero-padded bottom/right,
    H_pad / W_pad rounded up to multiples of 32.
    """
    n, c, h, w = x.shape
    h_pad = _round_up(h, SIZE_DIVISIBLE)
    w_pad = _round_up(w, SIZE_DIVISIBLE)
    if h_pad == h and w_pad == w:
        return x  # already aligned: batch_images is a pure stack, no copy needed

    if block_bytes_budget is None:
        block_bytes_budget = _default_block_budget()
    block_bytes_budget = max(int(block_bytes_budget), 1)

    p = n * c
    x_flat = x.reshape(p, h, w)
    itemsize = jnp.dtype(x.dtype).itemsize
    plane_bytes = (h * w + h_pad * w_pad) * itemsize
    cost = pl.CostEstimate(
        flops=0,
        transcendentals=0,
        bytes_accessed=(p * h * w + p * h_pad * w_pad) * itemsize,
    )
    out_shape = jax.ShapeDtypeStruct((p, h_pad, w_pad), x.dtype)
    # Double-buffered (in + out) blocks plus headroom, capped for v7x's VMEM.
    vmem_limit = int(min(2 * block_bytes_budget + 16 * _MIB, 48 * _MIB))

    if plane_bytes <= block_bytes_budget:
        # Small planes: batch several whole planes per grid step (amortize the
        # ~0.35 us per-step overhead), but keep >= 2 grid steps when possible
        # so v7x's 2 TensorCores both get work. Ragged last block is fine:
        # Pallas clips boundary blocks, and stale input planes are only
        # written to clipped output planes.
        max_planes = max(1, block_bytes_budget // plane_bytes)
        if p >= 2:
            max_planes = min(max_planes, _cdiv(p, 2))
        b = max(1, min(p, max_planes))
        num_steps = _cdiv(p, b)
        kernel = functools.partial(_pad_plane_kernel, h=h, w=w,
                                   h_pad=h_pad, w_pad=w_pad)
        out_flat = pl.pallas_call(
            kernel,
            out_shape=out_shape,
            grid=(num_steps,),
            in_specs=[pl.BlockSpec((b, h, w), lambda i: (i, 0, 0))],
            out_specs=pl.BlockSpec((b, h_pad, w_pad), lambda i: (i, 0, 0)),
            compiler_params=pltpu.CompilerParams(
                dimension_semantics=("parallel",),
                vmem_limit_bytes=vmem_limit),
            cost_estimate=cost,
        )(x_flat)
    else:
        # Large planes (realistic detection inputs, e.g. ~1333x1333 f32):
        # tile rows with cdiv/ragged tiling so the tile stays near the VMEM
        # budget regardless of H's factorization; the boundary mask handles
        # the ragged last tile and the bottom-padding rows.
        sublane_mult = max(8, 32 // itemsize)   # 8 for f32, 16 for bf16, ...
        row_bytes = (w + w_pad) * itemsize
        max_rows = max(sublane_mult, block_bytes_budget // row_bytes)
        tile_h = max(sublane_mult, (max_rows // sublane_mult) * sublane_mult)
        tile_h = min(tile_h, h_pad)             # h_pad is a multiple of 32
        num_row_tiles = _cdiv(h_pad, tile_h)
        max_in_block = max(0, _cdiv(h, tile_h) - 1)

        def in_index_map(i, r):
            # Clamp so row tiles at/past H still map to a valid input block;
            # the kernel's output-row mask zeroes everything past H anyway.
            return (i, jnp.minimum(r, max_in_block), 0)

        kernel = functools.partial(_pad_rows_kernel, h=h, w=w,
                                   w_pad=w_pad, tile_h=tile_h)
        out_flat = pl.pallas_call(
            kernel,
            out_shape=out_shape,
            grid=(p, num_row_tiles),
            in_specs=[pl.BlockSpec((1, tile_h, w), in_index_map)],
            out_specs=pl.BlockSpec((1, tile_h, w_pad), lambda i, r: (i, r, 0)),
            compiler_params=pltpu.CompilerParams(
                dimension_semantics=("parallel", "parallel"),
                vmem_limit_bytes=vmem_limit),
            cost_estimate=cost,
        )(x_flat)

    return out_flat.reshape(n, c, h_pad, w_pad)


class ImageList:
    """Minimal stand-in for torchvision.models.detection.image_list.ImageList."""

    def __init__(self, tensors, image_sizes):
        self.tensors = tensors
        self.image_sizes = image_sizes


def noop_transform(images, targets):
    """Forward pass of NoopTransform.

    images: list of (C, H, W) arrays (all the same shape).
    targets: arbitrary dict, returned unmodified.
    """
    shapes = {tuple(im.shape) for im in images}
    # TODO(synk): heterogeneous per-image sizes (batch_images pads each image
    # to the per-batch max); here all images share one shape, the common case.
    assert len(shapes) == 1, "this kernel handles same-sized images only"

    x = jnp.stack(images, axis=0)  # (N, C, H, W)
    batched = batch_images_pallas(x)

    # Matches the module exactly: it iterates the *batched* tensor, so every
    # recorded size is the padded size (H_pad, W_pad).
    image_sizes = [(int(batched.shape[2]), int(batched.shape[3]))] * int(batched.shape[0])
    return ImageList(batched, image_sizes), targets


if __name__ == "__main__":
    key = jax.random.PRNGKey(0)
    k1, k2, k3, k4, k5 = jax.random.split(key, 5)

    # ---- main example: NoopTransform forward on a small batch --------------
    n, c, h, w = 2, 4, 16, 16
    images = [
        jax.random.normal(k1, (c, h, w), dtype=jnp.float32),
        jax.random.normal(k2, (c, h, w), dtype=jnp.float32),
    ]
    targets = {"boxes": jnp.zeros((3, 4), jnp.float32),
               "labels": jnp.ones((3,), jnp.int32)}

    image_list, out_targets = noop_transform(images, targets)
    jax.block_until_ready(image_list.tensors)

    x = jnp.stack(images, axis=0)
    h_pad = _round_up(h, SIZE_DIVISIBLE)
    w_pad = _round_up(w, SIZE_DIVISIBLE)
    ref = jnp.pad(x, ((0, 0), (0, 0), (0, h_pad - h), (0, w_pad - w)))
    assert image_list.tensors.shape == (n, c, h_pad, w_pad)
    assert image_list.tensors.dtype == x.dtype
    assert image_list.image_sizes == [(h_pad, w_pad)] * n
    assert out_targets is targets
    assert jnp.allclose(image_list.tensors, ref)

    # ---- ragged plane batching (plane count not a multiple of the block) ---
    x3 = jax.random.normal(k3, (1, 3, 16, 48), dtype=jnp.float32)
    out3 = batch_images_pallas(x3)
    jax.block_until_ready(out3)
    ref3 = jnp.pad(x3, ((0, 0), (0, 0), (0, 32 - 16), (0, 64 - 48)))
    assert out3.shape == (1, 3, 32, 64)
    assert jnp.allclose(out3, ref3)

    # ---- row-tiled path (forced small budget), tile_h divides h_pad --------
    x2 = jax.random.normal(k4, (1, 2, 36, 48), dtype=jnp.float32)
    out2 = batch_images_pallas(x2, block_bytes_budget=4096)
    jax.block_until_ready(out2)
    ref2 = jnp.pad(x2, ((0, 0), (0, 0), (0, 64 - 36), (0, 64 - 48)))
    assert out2.shape == (1, 2, 64, 64)
    assert jnp.allclose(out2, ref2)

    # ---- row-tiled path with ragged last row tile (tile_h does not divide) -
    x4 = jax.random.normal(k5, (1, 1, 40, 130), dtype=jnp.float32)
    out4 = batch_images_pallas(x4, block_bytes_budget=28000)
    jax.block_until_ready(out4)
    ref4 = jnp.pad(x4, ((0, 0), (0, 0), (0, 64 - 40), (0, 160 - 130)))
    assert out4.shape == (1, 1, 64, 160)
    assert jnp.allclose(out4, ref4)

    print("KERNEL_OK")
</pallas_src>

<mosaic_0001>
module attributes {stable_mosaic.version = 11 : i64} {
  func.func @_pad_plane_kernel(%arg0: i32, %arg1: memref<4x16x16xf32, #tpu.memory_space<vmem>>, %arg2: memref<4x32x32xf32, #tpu.memory_space<vmem>>) attributes {dimension_semantics = [#tpu.dimension_semantics<parallel>], iteration_bounds = array<i64: 2>, scalar_prefetch = 0 : i64, scratch_operands = 0 : i64, tpu.core_type = #tpu.core_type<tc>, window_params = [{transform_indices = @transform_0, window_bounds = array<i64: 4, 16, 16>}, {transform_indices = @transform_1, window_bounds = array<i64: 4, 32, 32>}]} {
    %c0 = arith.constant 0 : index
    %c0_0 = arith.constant 0 : index
    %c0_1 = arith.constant 0 : index
    %0 = vector.load %arg1[%c0, %c0_0, %c0_1] : memref<4x16x16xf32, #tpu.memory_space<vmem>>, vector<4x16x16xf32>
    %c0_2 = arith.constant 0 : index
    %c0_3 = arith.constant 0 : index
    %c0_4 = arith.constant 0 : index
    %1 = vector.load %arg2[%c0_2, %c0_3, %c0_4] : memref<4x32x32xf32, #tpu.memory_space<vmem>>, vector<4x16x16xf32>
    tpu.vector_store %arg2[%c0_2, %c0_3, %c0_4], %0 {strides = array<i32>} : memref<4x32x32xf32, #tpu.memory_space<vmem>>, vector<4x16x16xf32>,
    %cst = arith.constant 0.000000e+00 : f32
    %2 = vector.broadcast %cst : f32 to vector<4x16x16xf32>
    %c0_5 = arith.constant 0 : index
    %c0_6 = arith.constant 0 : index
    %c16 = arith.constant 16 : index
    %3 = vector.load %arg2[%c0_5, %c0_6, %c16] : memref<4x32x32xf32, #tpu.memory_space<vmem>>, vector<4x16x16xf32>
    tpu.vector_store %arg2[%c0_5, %c0_6, %c16], %2 {strides = array<i32>} : memref<4x32x32xf32, #tpu.memory_space<vmem>>, vector<4x16x16xf32>,
    %cst_7 = arith.constant 0.000000e+00 : f32
    %4 = vector.broadcast %cst_7 : f32 to vector<4x16x32xf32>
    %c0_8 = arith.constant 0 : index
    %c16_9 = arith.constant 16 : index
    %c0_10 = arith.constant 0 : index
    %5 = vector.load %arg2[%c0_8, %c16_9, %c0_10] : memref<4x32x32xf32, #tpu.memory_space<vmem>>, vector<4x16x32xf32>
    tpu.vector_store %arg2[%c0_8, %c16_9, %c0_10], %4 {strides = array<i32>} : memref<4x32x32xf32, #tpu.memory_space<vmem>>, vector<4x16x32xf32>,
    return
  }
  func.func @transform_0(%arg0: i32) -> (i32, i32, i32) {
    %c0_i32 = arith.constant 0 : i32
    %c0_i32_0 = arith.constant 0 : i32
    %c0_i32_1 = arith.constant 0 : i32
    return %arg0, %c0_i32, %c0_i32_0 : i32, i32, i32
  }
  func.func @transform_1(%arg0: i32) -> (i32, i32, i32) {
    %c0_i32 = arith.constant 0 : i32
    %c0_i32_0 = arith.constant 0 : i32
    %c0_i32_1 = arith.constant 0 : i32
    return %arg0, %c0_i32, %c0_i32_0 : i32, i32, i32
  }
}

</mosaic_0001>

<bundles_post_ra>
// kernel: tpu_custom_call.1
= control target key start
LH: loop header
LB: loop body
LE: loop exit
PB: predicated region body
PF: predicated region fallthrough
CT: control target
= control target key end

     0   :  { %6 = vsyncpa [#allocation3], 0  ;;  %s620_s0 = inlined_call_operand.hbm [shape: f32[8,16,16], index: 0, kind: input, shape index: {}]   ;;  %s621_s1 = inlined_call_operand.hbm [shape: f32[8,32,32], index: 1, kind: output, shape index: {}]  }
   0x1   :  { %8 = vsyncpa [#allocation3 + $0x1], 0 }
   0x2   :  { %9 = vsyncpa [#allocation4], 0 }
   0x3   :  { %11 = vsyncpa [#allocation4 + $0x1], 0  ;;  %s449_s6 = smov 0   ;;  %s451_s7 = smov 0  }
   0x4   :  { %s453_s8 = smov 0   ;;  %s455_s9 = smov 0  }
   0x5 LB: > { %s470_s10 = sadd.s32 4294967295, %s432_s9   ;;  %s265_s11 = sadd.s32 4294967294, %s432_s9   ;;  %s432_s9 = sphi %s455_s9, %s631_s9   ;;  %s428_s8 = sphi %s453_s8, %s630_s8   ;;  %s424_s7 = sphi %s451_s7, %s629_s7   ;;  %s420_s6 = sphi %s449_s6, %s628_s6  }
   0x6   : > { %s474_s12 = sadd.s32 1, %s432_s9   ;;  %s24_s13 = sadd.s32 1, %s428_s8 }
   0x7   : > { %s21_s14 = ssub.s32 %s432_s9, %s474_s12  ;;  %p31_p0 = scmp.ne.s32.totalorder %s428_s8, %s424_s7 }
   0x8   : > { %p22_p1 = scmp.eq.s32.totalorder %s21_s14, 0  ;;  %p32_p2 = scmp.eq.s32.totalorder %s432_s9, 0 }
   0x9   : > { %p37_p3 = scmp.ne.s32.totalorder %s424_s7, %s420_s6  ;;  %p38_p4 = scmp.eq.s32.totalorder %s470_s10, 0 }
   0xa   : > { %s486_s15 = scalar_select %p22_p1, %s428_s8, %s24_s13  }
   0xb   : > { %p488_p5 = por %p32_p2, %p31_p0  ;;  %p492_p6 = por %p38_p4, %p37_p3 }
   0xc   : > { %p61_p7 = scmp.eq.s32.totalorder %s470_s10, 1  ;;  %p67_p8 = scmp.eq.s32.totalorder %s265_s11, 1 }
   0xd   : > { %p297_p10 = scmp.lt.s32.totalorder %s432_s9, 2  ;;  %s87_s20 = sand.u32 1, %s428_s8  }
   0xe   : > { %p499_p11 = por %p61_p7, %p31_p0  ;;  %p503_p12 = por %p67_p8, %p37_p3 }
   0xf   : > { %s282_s21 = sshll.u32 %s432_s9, 6  ;;  %s268_s22 = sshll.u32 %s87_s20, 6 }
  0x10   : > { %s97_s25 = scalar_lea.hbm %s620_s0, %s282_s21  ;;  %s91_s27 = scalar_lea.vmem [#allocation2], %s268_s22 }
  0x11   : > { %s98_s26 = sshll.u32 %s97_s25, 4  ;;  %s100_s28 = sshll.u32 %s91_s27, 4  ;;  %s99_s26 = int_to_ptr.hbm [resolvable:$true] %s98_s26  ;;  %s101_s28 = int_to_ptr.vmem [resolvable:$true] %s100_s28 }
  0x12   : > { %p514_p13 = pnand %p297_p10, %p488_p5  ;;  %p272_p0 = scmp.ge.s32.totalorder %s432_s9, 1 }
  0x13   : > { %p108_p1 = scmp.lt.s32.totalorder %s432_s9, 3  ;;  %s88_s30 = scalar_lea.sflag [#allocation3], %s87_s20 }
  0x14   : > { %s336_s2 = sshra.s32 %s99_s26, 4  ;;  %p340_p3 = pneg %p514_p13  ;;  %s337_s2 = int_to_ptr.hbm [resolvable:$true] %s336_s2 }
  0x15   : > { %s338_s3 = scalar_lea.hbm %s337_s2, 64  ;;  %s343_s11 = scalar_lea.hbm %s620_s0, 128 }
  0x16   : > { %p339_p2 = scmp.ne.s32.totalorder %s337_s2, %s338_s3  ;;  %p344_p5 = scmp.lt.s32.totalorder %s337_s2, %s620_s0 }
  0x17   : > { %p345_p8 = scmp.lt.s32.totalorder %s343_s11, %s338_s3 }
  0x18   : > { %p341_p4 = pnand %p340_p3, %p339_p2 }
  0x19   : > { %p346_p10 = por %p345_p8, %p344_p5 }
  0x1a   : > { %p342_p7 = pneg %p341_p4 }
  0x1c   : > { %p347_p9 = pnand %p346_p10, %p342_p7 }
  0x1e   : > { %350 = shalt.err (!%p347_p9)
}
  0x1f   : > { %s434_s16 = smov 128   ;;  %s435_s20 = smov 8  }
  0x20   : > { %292 = dma.hbm_to_vmem [thread:$0]  (!%p514_p13), %s99_s26, 1024, %s101_s28, %s88_s30, %s434_s16, %s434_s16, %s435_s20  }
  0x21   : > { %p109_p2 = pnand %p272_p0, %p108_p1 }
  0x22   : > { %s535_s21 = sand.u32 (!%p109_p2), 1, %s424_s7  }
  0x23   : > { %112 = sbr.rel (%p109_p2) target bundleno = 70 (0x46), region = 24  ;;  %s273_s22 = sshll.u32 (!%p109_p2), %s535_s21, 6 }
  0x24   : > { %s115_s23 = scalar_lea.sflag (!%p109_p2), [#allocation3], %s535_s21  ;;  %s118_s24 = scalar_lea.vmem (!%p109_p2), [#allocation2], %s273_s22 }
  0x28   : > { %411 = dma.done.wait (%p492_p6), %s115_s23, 1024  }
  0x29   : > { %413 = vsyncadd (%p492_p6), %s115_s23, 4294966272  ;;  %s274_s25 = sshll.u32 %s535_s21, 7  ;;  %vm166_vm0 = vcmask 261120   ;;  %v436_v0 = vmov 0.0   ;;  %vm148_vm1 = vcmask 130048   ;;  %v140_v1 = vld [vmem:[%s118_s24] sm:$0xff] }
  0x2a   : > { %s544_s26 = scalar_lea.vmem [#allocation5], %s274_s25  ;;  %v141_v2 = vld [vmem:[%s118_s24 + $0x8] sm:$0xff]  ;;  %v142_v3 = vld [vmem:[%s118_s24 + $0x10] sm:$0xff]  ;;  %v143_v4 = vld [vmem:[%s118_s24 + $0x18] sm:$0xff]  ;;  %vm157_vm2 = vcmask 261248   ;;  %s284_s17 = sshll.u32 %s470_s10, 7 }
  0x2b   : > { %167 = vst.msk [vmem:[%s544_s26 + $0x10] sm:$0xff] %vm166_vm0, %v436_v0  ;;  %v144_v5 = vld [vmem:[%s118_s24 + $0x20] sm:$0xff]  ;;  %v145_v6 = vld [vmem:[%s118_s24 + $0x28] sm:$0xff]  ;;  %v146_v7 = vld [vmem:[%s118_s24 + $0x30] sm:$0xff]  ;;  %s188_s29 = scalar_lea.hbm %s621_s1, %s284_s17  ;;  %s189_s30 = sshll.u32 %s544_s26, 4  ;;  %s190_s30 = int_to_ptr.vmem [resolvable:$true] %s189_s30 }
  0x2c   : > { %168 = vst.msk [vmem:[%s544_s26 + $0x18] sm:$0xff] %vm166_vm0, %v436_v0  ;;  %v147_v8 = vld [vmem:[%s118_s24 + $0x38] sm:$0xff]  ;;  %s191_s2 = sshll.u32 %s188_s29, 4  ;;  %s176_s10 = scalar_lea.sflag [#allocation4], %s535_s21  ;;  %s192_s2 = int_to_ptr.hbm [resolvable:$true] %s191_s2 }
  0x2d   : > { %169 = vst.msk [vmem:[%s544_s26 + $0x30] sm:$0xff] %vm166_vm0, %v436_v0  ;;  %s380_s3 = sshra.s32 %s192_s2, 4  ;;  %s386_s13 = scalar_lea.hbm %s621_s1, 256  ;;  %s381_s3 = int_to_ptr.hbm [resolvable:$true] %s380_s3 }
  0x2e   : > { %170 = vst.msk [vmem:[%s544_s26 + $0x38] sm:$0xff] %vm166_vm0, %v436_v0  ;;  %s382_s4 = scalar_lea.hbm %s381_s3, 128  ;;  %p387_p0 = scmp.lt.s32.totalorder %s381_s3, %s621_s1 }
  0x2f   : > { %171 = vst.msk [vmem:[%s544_s26 + $0x50] sm:$0xff] %vm166_vm0, %v436_v0  ;;  %p383_p6 = scmp.ne.s32.totalorder %s381_s3, %s382_s4  ;;  %p388_p1 = scmp.lt.s32.totalorder %s386_s13, %s382_s4 }
  0x30   : > { %172 = vst.msk [vmem:[%s544_s26 + $0x58] sm:$0xff] %vm166_vm0, %v436_v0 }
  0x31   : > { %149 = vst.msk [vmem:[%s544_s26] sm:$0xff] %vm148_vm1, %v140_v1  ;;  %p384_p9 = pnand %p383_p6, %p499_p11  ;;  %p389_p3 = por %p388_p1, %p387_p0 }
  0x32   : > { %150 = vst.msk [vmem:[%s544_s26 + $0x8] sm:$0xff] %vm148_vm1, %v141_v2 }
  0x33   : > { %151 = vst.msk [vmem:[%s544_s26 + $0x20] sm:$0xff] %vm148_vm1, %v142_v3  ;;  %p385_p13 = pneg %p384_p9 }
  0x34   : > { %152 = vst.msk [vmem:[%s544_s26 + $0x28] sm:$0xff] %vm148_vm1, %v143_v4 }
  0x35   : > { %153 = vst.msk [vmem:[%s544_s26 + $0x40] sm:$0xff] %vm148_vm1, %v144_v5  ;;  %p390_p4 = pnand %p389_p3, %p385_p13 }
  0x36   : > { %154 = vst.msk [vmem:[%s544_s26 + $0x48] sm:$0xff] %vm148_vm1, %v145_v6 }
  0x37   : > { %155 = vst.msk [vmem:[%s544_s26 + $0x60] sm:$0xff] %vm148_vm1, %v146_v7 }
  0x38   : > { %156 = vst.msk [vmem:[%s544_s26 + $0x68] sm:$0xff] %vm148_vm1, %v147_v8 }
  0x39   : > { %158 = vst.msk [vmem:[%s544_s26] sm:$0xff] %vm157_vm2, %v436_v0 }
  0x3a   : > { %159 = vst.msk [vmem:[%s544_s26 + $0x8] sm:$0xff] %vm157_vm2, %v436_v0 }
  0x3b   : > { %160 = vst.msk [vmem:[%s544_s26 + $0x20] sm:$0xff] %vm157_vm2, %v436_v0 }
  0x3c   : > { %161 = vst.msk [vmem:[%s544_s26 + $0x28] sm:$0xff] %vm157_vm2, %v436_v0 }
  0x3d   : > { %162 = vst.msk [vmem:[%s544_s26 + $0x40] sm:$0xff] %vm157_vm2, %v436_v0 }
  0x3e   : > { %163 = vst.msk [vmem:[%s544_s26 + $0x48] sm:$0xff] %vm157_vm2, %v436_v0 }
  0x3f   : > { %164 = vst.msk [vmem:[%s544_s26 + $0x60] sm:$0xff] %vm157_vm2, %v436_v0 }
  0x40   : > { %165 = vst.msk [vmem:[%s544_s26 + $0x68] sm:$0xff] %vm157_vm2, %v436_v0 }
  0x41   : > { %173 = vst.msk [vmem:[%s544_s26 + $0x70] sm:$0xff] %vm166_vm0, %v436_v0 }
  0x42   : > { %174 = vst.msk [vmem:[%s544_s26 + $0x78] sm:$0xff] %vm166_vm0, %v436_v0 }
  0x43   : > { %393 = shalt.err (!%p390_p4)
}
  0x44   : > { %s437_s20 = smov 128   ;;  %s438_s21 = smov 8  }
  0x45   : > { %287 = dma.vmem_to_hbm [thread:$0]  (%p499_p11), %s190_s30, 2048, %s192_s2, %s176_s10, %s437_s20, %s437_s20, %s438_s21  }
  0x46 PF: > { %s206_s22 = sand.u32 1, %s420_s6   ;;  %p627_p7 = scmp.ge.s32.totalorder %s432_s9, 2 }
  0x47   : > { %s207_s23 = scalar_lea.sflag [#allocation4], %s206_s22 }
  0x48   : > { %p294_p5 = pnand %p627_p7, %p503_p12 }
  0x4a   : > { %p295_p8 = pneg %p294_p5 }
  0x4c   : > { %415 = dma.done.wait (%p295_p8), %s207_s23, 2048  }
  0x4d   : > { %417 = vsyncadd (%p295_p8), %s207_s23, 4294965248  ;;  %p14_p10 = scmp.ge.s32.totalorder %s474_s12, 4   ;;  %s628_s6 = smov %s424_s7 }
  0x4e   : > { %s629_s7 = smov %s428_s8  ;;  %s630_s8 = smov %s486_s15 }
  0x4f   : > { %s631_s9 = smov %s474_s12  ;;  %16 = sbr.rel (!%p14_p10) target bundleno = 5 (0x5), region = 69 }
  0x54   :  { %213 = vsyncpa [#allocation3], 1 }
  0x55   :  { %215 = vsyncpa [#allocation3 + $0x1], 1 }
  0x56   :  { %216 = vsyncpa [#allocation4], 1 }
  0x57   :  { %218 = vsyncpa [#allocation4 + $0x1], 1 }

</bundles_post_ra>
